<compile_context>
chip_gen: v7x
topology: tpu7x:2x2x1
jax: 0.10.0
libtpu: 0.0.40
codegen_flags: <defaults>
</compile_context>

<pallas_src>
from functools import partial

import jax
import jax.numpy as jnp
from jax import lax
from jax.experimental import pallas as pl
from jax.experimental.pallas import tpu as pltpu


def _ts_loss_kernel(tgt_ref, pred_ref, out_ref, acc_ref, *,
                    scale, t_total, t_tile, mask_time):
    """One (batch-tile, time-tile) grid step.

    tgt_ref, pred_ref : (TB, TT, C) VMEM tiles
    out_ref           : (TB, 1)     VMEM tile (resident across the time axis)
    acc_ref           : (TB, C)     f32 VMEM scratch, lane-dense accumulator
    """
    t_id = pl.program_id(1)

    @pl.when(t_id == 0)
    def _init():
        acc_ref[...] = jnp.zeros_like(acc_ref)

    t = tgt_ref[...].astype(jnp.float32)
    p = pred_ref[...].astype(jnp.float32)
    diff = t - p
    sq = diff * diff                                   # elementwise l(x_t, x_hat_t) on the VPU

    if mask_time:
        # Last time tile may be padded with stale VMEM rows: zero them out.
        row = t_id * t_tile + lax.broadcasted_iota(jnp.int32, sq.shape, 1)
        sq = jnp.where(row < t_total, sq, 0.0)

    # Reduce only the time axis per tile; channels stay lane-dense so the
    # width-128 cross-lane reduce happens exactly once per output element.
    acc_ref[...] += jnp.sum(sq, axis=1)                # (TB, C)

    @pl.when(t_id == pl.num_programs(1) - 1)
    def _finalize():
        per_b = jnp.sum(acc_ref[...], axis=-1, keepdims=True)   # (TB, 1) lane reduce
        out_ref[...] = (per_b * scale).astype(out_ref.dtype)


def _choose_tiles(B, T, C, itemsize, target_bytes=4 * 1024 * 1024):
    """Pick (TB, TT) so one input tile is ~4 MiB (v7x-safe, big enough for v5e/v6e)."""
    # Batch tile: full batch if small, else 8 (keeps the (TB,1) output block legal).
    tb = B if B <= 8 else 8
    # Time tile: as many rows as fit the per-buffer budget, rounded to a
    # multiple of 8 (sublane), or the full T if it all fits.
    budget_rows = max(1, target_bytes // max(1, tb * C * itemsize))
    if budget_rows >= T:
        tt = T
    else:
        tt = min(T, max(8, (budget_rows // 8) * 8))
    return tb, tt


def timeseries_loss(targets, predictions, *, normalize_time=True,
                    normalize_channels=False, block_b=None, block_t=None):
    """TimeSeriesBaseLoss forward (squared-error realization).

    targets, predictions: (B, T, C) float arrays. Returns (B,) float32.
    """
    assert targets.shape == predictions.shape
    B, T, C = targets.shape
    itemsize = jnp.dtype(targets.dtype).itemsize

    tb_auto, tt_auto = _choose_tiles(B, T, C, itemsize)
    tb = tb_auto if block_b is None else block_b
    tt = tt_auto if block_t is None else block_t

    scale = (1.0 / T if normalize_time else 1.0) * \
            (1.0 / C if normalize_channels else 1.0)

    nb = pl.cdiv(B, tb)
    nt = pl.cdiv(T, tt)
    mask_time = (T % tt) != 0

    # 2 inputs x 2 pipeline buffers per tile, plus accumulator/output headroom.
    tile_bytes = tb * tt * C * itemsize
    vmem_limit = int(min(96 * 1024 * 1024,
                         max(16 * 1024 * 1024, 4 * tile_bytes + 8 * 1024 * 1024)))

    # NOTE: for tiny inputs (single-vreg sized) the pallas_call launch overhead
    # dominates; callers may prefer to let XLA fuse this directly.
    kernel = partial(_ts_loss_kernel, scale=scale, t_total=T, t_tile=tt,
                     mask_time=mask_time)

    out = pl.pallas_call(
        kernel,
        out_shape=jax.ShapeDtypeStruct((B, 1), jnp.float32),
        grid_spec=pltpu.PrefetchScalarGridSpec(
            num_scalar_prefetch=0,
            grid=(nb, nt),                                   # reduction (time) axis last
            in_specs=[
                pl.BlockSpec((tb, tt, C), lambda b, t: (b, t, 0)),
                pl.BlockSpec((tb, tt, C), lambda b, t: (b, t, 0)),
            ],
            out_specs=pl.BlockSpec((tb, 1), lambda b, t: (b, 0)),  # resident across t
            scratch_shapes=[pltpu.VMEM((tb, C), jnp.float32)],
        ),
        compiler_params=pltpu.CompilerParams(
            dimension_semantics=("parallel", "arbitrary"),   # batch parallel (v7x 2 TCs)
            vmem_limit_bytes=vmem_limit,
        ),
    )(targets, predictions)
    return out[:, 0]


if __name__ == "__main__":
    # TimeSeriesBaseLoss.__init__ has no learnable parameters -> nothing to initialize.
    key = jax.random.PRNGKey(0)

    def ref_loss(t, p, normalize_time=True, normalize_channels=False):
        sq = (t.astype(jnp.float32) - p.astype(jnp.float32)) ** 2
        chan = jnp.mean if normalize_channels else jnp.sum
        time = jnp.mean if normalize_time else jnp.sum
        return time(chan(sq, axis=-1), axis=-1)

    # Case 1: default small shape (B, T, C) = (2, 8, 16), f32, single grid step.
    k1, k2 = jax.random.split(key)
    B, T, C = 2, 8, 16
    targets = jax.random.normal(k1, (B, T, C), dtype=jnp.float32)
    predictions = jax.random.normal(k2, (B, T, C), dtype=jnp.float32)
    loss = jax.block_until_ready(timeseries_loss(targets, predictions))
    assert loss.shape == (B,)
    assert jnp.allclose(loss, ref_loss(targets, predictions), rtol=1e-5, atol=1e-5)

    # Case 2: exercise the (B, T) grid, the time-resident accumulator, ragged-T
    # masking, and bf16 inputs, with explicit small tiles.
    k3, k4 = jax.random.split(k1)
    B2, T2, C2 = 16, 60, 16
    tgt2 = jax.random.normal(k3, (B2, T2, C2), dtype=jnp.bfloat16)
    pred2 = jax.random.normal(k4, (B2, T2, C2), dtype=jnp.bfloat16)
    loss2 = jax.block_until_ready(timeseries_loss(tgt2, pred2, block_t=16))
    assert loss2.shape == (B2,)
    assert jnp.allclose(loss2, ref_loss(tgt2, pred2), rtol=1e-4, atol=1e-4)

    # TODO(synk): forward() is abstract in the base class; the squared-error element
    # loss here is the canonical default realization (TimeSeriesMSE with default flags).
    print("KERNEL_OK")
</pallas_src>

<mosaic_0001>
module attributes {stable_mosaic.version = 11 : i64} {
  func.func @_ts_loss_kernel(%arg0: i32, %arg1: i32, %arg2: memref<2x8x16xf32, #tpu.memory_space<vmem>>, %arg3: memref<2x8x16xf32, #tpu.memory_space<vmem>>, %arg4: memref<2x1xf32, #tpu.memory_space<vmem>>, %arg5: memref<2x16xf32, #tpu.memory_space<vmem>>) attributes {dimension_semantics = [#tpu.dimension_semantics<parallel>, #tpu.dimension_semantics<arbitrary>], iteration_bounds = array<i64: 1, 1>, scalar_prefetch = 0 : i64, scratch_operands = 1 : i64, tpu.core_type = #tpu.core_type<tc>, window_params = [{transform_indices = @transform_0, window_bounds = array<i64: 2, 8, 16>}, {transform_indices = @transform_1, window_bounds = array<i64: 2, 8, 16>}, {transform_indices = @transform_2, window_bounds = array<i64: 2, 1>}]} {
    %c0_i32 = arith.constant 0 : i32
    %0 = arith.cmpi eq, %arg1, %c0_i32 : i32
    %1 = arith.extui %0 : i1 to i32
    %c0_i32_0 = arith.constant 0 : i32
    %2 = arith.cmpi ne, %1, %c0_i32_0 : i32
    scf.if %2 {
      %cst_12 = arith.constant 0.000000e+00 : f32
      %14 = vector.broadcast %cst_12 : f32 to vector<2x16xf32>
      %c0_13 = arith.constant 0 : index
      %c0_14 = arith.constant 0 : index
      %15 = vector.load %arg5[%c0_13, %c0_14] : memref<2x16xf32, #tpu.memory_space<vmem>>, vector<2x16xf32>
      tpu.vector_store %arg5[%c0_13, %c0_14], %14 {strides = array<i32>} : memref<2x16xf32, #tpu.memory_space<vmem>>, vector<2x16xf32>,
    } else {
    }
    %c0 = arith.constant 0 : index
    %c0_1 = arith.constant 0 : index
    %c0_2 = arith.constant 0 : index
    %3 = vector.load %arg2[%c0, %c0_1, %c0_2] : memref<2x8x16xf32, #tpu.memory_space<vmem>>, vector<2x8x16xf32>
    %c0_3 = arith.constant 0 : index
    %c0_4 = arith.constant 0 : index
    %c0_5 = arith.constant 0 : index
    %4 = vector.load %arg3[%c0_3, %c0_4, %c0_5] : memref<2x8x16xf32, #tpu.memory_space<vmem>>, vector<2x8x16xf32>
    %5 = arith.subf %3, %4 : vector<2x8x16xf32>
    %6 = arith.mulf %5, %5 : vector<2x8x16xf32>
    %c0_6 = arith.constant 0 : index
    %c0_7 = arith.constant 0 : index
    %7 = vector.load %arg5[%c0_6, %c0_7] : memref<2x16xf32, #tpu.memory_space<vmem>>, vector<2x16xf32>
    %cst = arith.constant dense<0.000000e+00> : vector<2x16xf32>
    %8 = vector.multi_reduction <add>, %6, %cst [1] : vector<2x8x16xf32> to vector<2x16xf32>
    %9 = arith.addf %7, %8 : vector<2x16xf32>
    %c0_8 = arith.constant 0 : index
    %c0_9 = arith.constant 0 : index
    %10 = vector.load %arg5[%c0_8, %c0_9] : memref<2x16xf32, #tpu.memory_space<vmem>>, vector<2x16xf32>
    tpu.vector_store %arg5[%c0_8, %c0_9], %9 {strides = array<i32>} : memref<2x16xf32, #tpu.memory_space<vmem>>, vector<2x16xf32>,
    %c0_i32_10 = arith.constant 0 : i32
    %11 = arith.cmpi eq, %arg1, %c0_i32_10 : i32
    %12 = arith.extui %11 : i1 to i32
    %c0_i32_11 = arith.constant 0 : i32
    %13 = arith.cmpi ne, %12, %c0_i32_11 : i32
    scf.if %13 {
      %c0_12 = arith.constant 0 : index
      %c0_13 = arith.constant 0 : index
      %14 = vector.load %arg5[%c0_12, %c0_13] : memref<2x16xf32, #tpu.memory_space<vmem>>, vector<2x16xf32>
      %cst_14 = arith.constant dense<0.000000e+00> : vector<2xf32>
      %15 = vector.multi_reduction <add>, %14, %cst_14 [1] : vector<2x16xf32> to vector<2xf32>
      %16 = vector.shape_cast %15 : vector<2xf32> to vector<2x1xf32>
      %cst_15 = arith.constant 1.250000e-01 : f32
      %17 = vector.broadcast %cst_15 : f32 to vector<2x1xf32>
      %18 = arith.mulf %16, %17 : vector<2x1xf32>
      %c0_16 = arith.constant 0 : index
      %c0_17 = arith.constant 0 : index
      %19 = vector.load %arg4[%c0_16, %c0_17] : memref<2x1xf32, #tpu.memory_space<vmem>>, vector<2x1xf32>
      tpu.vector_store %arg4[%c0_16, %c0_17], %18 {strides = array<i32>} : memref<2x1xf32, #tpu.memory_space<vmem>>, vector<2x1xf32>,
    } else {
    }
    return
  }
  func.func @transform_0(%arg0: i32, %arg1: i32) -> (i32, i32, i32) {
    %c0_i32 = arith.constant 0 : i32
    %c0_i32_0 = arith.constant 0 : i32
    return %arg0, %arg1, %c0_i32 : i32, i32, i32
  }
  func.func @transform_1(%arg0: i32, %arg1: i32) -> (i32, i32, i32) {
    %c0_i32 = arith.constant 0 : i32
    %c0_i32_0 = arith.constant 0 : i32
    return %arg0, %arg1, %c0_i32 : i32, i32, i32
  }
  func.func @transform_2(%arg0: i32, %arg1: i32) -> (i32, i32) {
    %c0_i32 = arith.constant 0 : i32
    %c0_i32_0 = arith.constant 0 : i32
    return %arg0, %c0_i32 : i32, i32
  }
}

</mosaic_0001>

<bundles_post_ra>
// kernel: tpu_custom_call.1
= control target key start
LH: loop header
LB: loop body
LE: loop exit
PB: predicated region body
PF: predicated region fallthrough
CT: control target
= control target key end

     0   :  { %7 = vsyncpa [#allocation4], 0  ;;  %s196_s0 = inlined_call_operand.hbm [shape: f32[2,8,16], index: 0, kind: input, shape index: {}]   ;;  %s197_s1 = inlined_call_operand.hbm [shape: f32[2,8,16], index: 1, kind: input, shape index: {}]   ;;  %s198_s2 = inlined_call_operand.vmem [shape: f32[2,1], index: 2, kind: output, shape index: {}]  }
   0x1   :  { %8 = vsyncpa [#allocation6], 0  ;;  %s146_s9 = smov [#allocation3]   ;;  %s98_s13 = scalar_lea.hbm %s196_s0, 256 }
   0x2   :  { %s14_s10 = sshll.u32 %s146_s9, 4  ;;  %p99_p0 = scmp.ne.s32.totalorder %s196_s0, %s98_s13  ;;  %s15_s10 = int_to_ptr.vmem [resolvable:$true] %s14_s10 }
   0x3   :  { %p102_p1 = scmp.lt.u32.totalorder %s98_s13, %s196_s0 }
   0x5   :  { %p104_p2 = pnand %p102_p1, %p99_p0 }
   0x7   :  { %107 = shalt.err (!%p104_p2)
}
   0x8   :  { %s108_s18 = scalar_lea.vmem %s15_s10, 256  ;;  %p113_p4 = scmp.lt.s32.totalorder %s15_s10, %s15_s10 }
   0x9   :  { %p109_p3 = scmp.ne.s32.totalorder %s15_s10, %s108_s18  ;;  %p114_p5 = scmp.lt.s32.totalorder %s108_s18, %s108_s18 }
   0xb   :  { %p115_p6 = por %p114_p5, %p113_p4 }
   0xd   :  { %p116_p7 = pnand %p115_p6, %p109_p3 }
   0xf   :  { %119 = shalt.err (!%p116_p7)
}
  0x10   :  { %s147_s19 = smov 128   ;;  %s148_s20 = smov 8  }
  0x11   :  { %20 = dma.hbm_to_vmem [thread:$0]  %s196_s0, 256, %s15_s10, [#allocation4], %s147_s19, %s147_s19, %s148_s20  }
  0x12   :  { %s149_s23 = smov [#allocation5]   ;;  %s120_s27 = scalar_lea.hbm %s197_s1, 256 }
  0x13   :  { %s26_s24 = sshll.u32 %s149_s23, 4  ;;  %p121_p8 = scmp.ne.s32.totalorder %s197_s1, %s120_s27  ;;  %s27_s24 = int_to_ptr.vmem [resolvable:$true] %s26_s24 }
  0x14   :  { %p124_p9 = scmp.lt.u32.totalorder %s120_s27, %s197_s1 }
  0x16   :  { %p126_p10 = pnand %p124_p9, %p121_p8 }
  0x18   :  { %129 = shalt.err (!%p126_p10)
}
  0x19   :  { %s130_s4 = scalar_lea.vmem %s27_s24, 256  ;;  %p135_p12 = scmp.lt.s32.totalorder %s27_s24, %s27_s24 }
  0x1a   :  { %p131_p11 = scmp.ne.s32.totalorder %s27_s24, %s130_s4  ;;  %p136_p13 = scmp.lt.s32.totalorder %s130_s4, %s130_s4 }
  0x1c   :  { %p137_p0 = por %p136_p13, %p135_p12 }
  0x1e   :  { %p138_p1 = pnand %p137_p0, %p131_p11 }
  0x20   :  { %141 = shalt.err (!%p138_p1)
}
  0x21   :  { %32 = dma.hbm_to_vmem [thread:$0]  %s197_s1, 256, %s27_s24, [#allocation6], %s147_s19, %s147_s19, %s148_s20  }
  0x22   :  { %142 = dma.done.wait [#allocation4], 256  }
  0x23   :  { %143 = vsyncadd [#allocation4], 4294967040 }
  0x24   :  { %144 = dma.done.wait [#allocation6], 256  }
  0x25   :  { %145 = vsyncadd [#allocation6], 4294967040  ;;  %vm43_vm0 = vcmask 123904   ;;  %v150_v0 = vmov 0.0   ;;  %v45_v1 = vld [vmem:[#allocation3] sm:$0xff]  ;;  %v46_v2 = vld [vmem:[#allocation3 + $0x8] sm:$0xff] }
  0x26   :  { %44 = vst.msk [vmem:[#allocation2] sm:$0x3] %vm43_vm0, %v150_v0  ;;  %v47_v3 = vld [vmem:[#allocation5] sm:$0xff]  ;;  %v48_v4 = vld [vmem:[#allocation5 + $0x8] sm:$0xff]  ;;  %vm54_vm1 = vcmask 130048   ;;  %vm71_vm2 = vcmask 1041409  }
  0x27   :  { %v49_v5 = vsub.f32 %v45_v1, %v47_v3  ;;  %v50_v6 = vsub.f32 %v46_v2, %v48_v4  ;;  %vm85_vm3 = vcmask 1024  }
  0x29   :  { %v51_v7 = vmul.f32 %v49_v5, %v49_v5  ;;  %v52_v8 = vmul.f32 %v50_v6, %v50_v6 }
  0x2b   :  { %v55_v9 = vsel %vm54_vm1, %v51_v7, 0.0  ;;  %v62_v11 = vsel %vm54_vm1, %v52_v8, 0.0 }
  0x2c   :  { %v56_v10 = vrot.slane %v55_v9, 4  ;;  %v63_v12 = vrot.slane %v62_v11, 4 }
  0x2d   :  { %v53_v22 = vld [vmem:[#allocation2] sm:$0x3] }
  0x2e   :  { %v57_v13 = vadd.f32 %v56_v10, %v55_v9  ;;  %v64_v14 = vadd.f32 %v63_v12, %v62_v11 }
  0x30   :  { %v58_v15 = vrot.slane %v57_v13, 2  ;;  %v65_v16 = vrot.slane %v64_v14, 2 }
  0x32   :  { %v59_v17 = vadd.f32 %v58_v15, %v57_v13  ;;  %v66_v18 = vadd.f32 %v65_v16, %v64_v14 }
  0x34   :  { %v60_v19 = vrot.slane %v59_v17, 1  ;;  %v67_v20 = vrot.slane %v66_v18, 1 }
  0x36   :  { %v61_v21 = vadd.f32 %v60_v19, %v59_v17  ;;  %v68_v23 = vadd.f32 %v67_v20, %v66_v18 }
  0x38   :  { %v72_v24 = vsel %vm71_vm2, %v68_v23, %v61_v21 }
  0x39   :  { %v74_v25 = vadd.f32 %v72_v24, %v53_v22 }
  0x3b   :  { %76 = vst.msk [vmem:[#allocation2] sm:$0x3] %vm43_vm0, %v74_v25 }
  0x42   :  { %v80_v26 = vld [vmem:[#allocation2] sm:$0x3] }
  0x43   :  { %v81_v27 = vsel %vm43_vm0, %v80_v26, 0.0 }
  0x44   :  { %82 = vadd.xlane.f32.xlu0 %v81_v27 }
  0xd1   :  { %v83_v28 = vpop.xlane.xlu0 %82 }
  0xd2   :  { %v84_v29 = vmul.f32 0.125, %v83_v28 }
  0xd4   :  { %86 = vst.msk [vmem:[%s198_s2] sm:$0x3] %vm85_vm3, %v84_v29 }
  0xd5   :  { %91 = vsyncpa [#allocation4], 1 }
  0xd6   :  { %92 = vsyncpa [#allocation6], 1 }

</bundles_post_ra>
